<compile_context>
chip_gen: v5e
topology: v5e:2x2
jax: 0.10.0
libtpu: 0.0.40
codegen_flags: <defaults>
</compile_context>

<pallas_src>
import math
import functools

import jax
import jax.numpy as jnp
from jax import lax
from jax.experimental import pallas as pl
from jax.experimental.pallas import tpu as pltpu


NEG_INF = -1e30  # finite "-inf": keeps the online softmax NaN-free.


# --------------------------- stage 1: in_proj (head-major out) ----------------

def _in_proj_kernel(x_ref, w_ref, b_ref, o_ref, *, n_heads, d_heads, compute_dtype):
    """qkv = x @ W_in^T + b_in, written directly in (chunk, head, row, dh) layout.

    Writing head-major here removes the mem-bound XLA transposes that used to
    sit between the two pallas_calls: the relayout happens on data that is still
    resident in VMEM right after the matmul (static lane slices, once per row
    tile), and the head-major layout gives stage 2 fully contiguous K/V streams.
    """
    x = x_ref[...].astype(compute_dtype)
    acc = jnp.dot(x, w_ref[...], preferred_element_type=jnp.float32) + b_ref[...]
    d_model = n_heads * d_heads
    for c in range(3):                         # torch chunk order: k, q, v
        for h in range(n_heads):
            off = c * d_model + h * d_heads
            o_ref[c, h, :, :] = acc[:, off:off + d_heads].astype(o_ref.dtype)


# ----------------- stage 2: flash attention + fused out_proj ------------------

def _flash_attn_kernel(q_ref, k_ref, v_ref, wo_ref, bo_ref, o_ref,
                       m_sc, l_sc, acc_sc,
                       *, n_heads, block_q, block_k, apply_mask, compute_dtype):
    qi = pl.program_id(1)
    kv = pl.program_id(2)

    @pl.when(kv == 0)
    def _init():
        m_sc[...] = jnp.full(m_sc.shape, NEG_INF, m_sc.dtype)
        l_sc[...] = jnp.zeros(l_sc.shape, l_sc.dtype)
        acc_sc[...] = jnp.zeros(acc_sc.shape, acc_sc.dtype)

    def _update():
        q = q_ref[...]                                    # (H, TQ, dh); scale pre-folded
        k = k_ref[...]                                    # (H, TK, dh)
        # Batched QK^T contracting the trailing dh dims with a leading batch dim
        # H; K is consumed untransposed, so no per-kv-tile transpose is emitted.
        s = lax.dot_general(q, k, (((2,), (2,)), ((0,), (0,))),
                            preferred_element_type=jnp.float32)   # (H, TQ, TK)

        if apply_mask:
            # TODO(synk): the original torch `mask *= -inf` on a bool tensor is
            # ill-typed; we implement the intended causal (upper-tri) mask.
            row = lax.broadcasted_iota(jnp.int32, (block_q, block_k), 0) + qi * block_q
            col = lax.broadcasted_iota(jnp.int32, (block_q, block_k), 1) + kv * block_k
            s = jnp.where((col > row)[None, :, :], NEG_INF, s)

        m_prev = m_sc[...]
        m_new = jnp.maximum(m_prev, jnp.max(s, axis=-1, keepdims=True))
        alpha = jnp.exp(m_prev - m_new)                   # finite: NEG_INF, never -inf
        # For small dh the EUP (exp) saturates before the MXU: run the big exp in
        # the compute dtype (bf16 on v6e/v7x ~2x EUP rate); keep f32 on the f32 path.
        p = jnp.exp((s - m_new).astype(compute_dtype))                  # (H, TQ, TK)
        l_sc[...] = alpha * l_sc[...] + jnp.sum(p.astype(jnp.float32),
                                                axis=-1, keepdims=True)
        pv = lax.dot_general(p, v_ref[...], (((2,), (1,)), ((0,), (0,))),
                             preferred_element_type=jnp.float32)        # (H, TQ, dh)
        acc_sc[...] = alpha * acc_sc[...] + pv
        m_sc[...] = m_new

    if apply_mask:
        # Skip kv tiles entirely above the diagonal (compute skipped here; the
        # matching DMA skip happens via the clamped k/v index_maps).
        pl.when(kv * block_k <= qi * block_q + (block_q - 1))(_update)
    else:
        _update()

    @pl.when(kv == pl.num_programs(2) - 1)
    def _finalize():
        # exact reciprocal on the f32/debug path, EUP approx on the bf16 path.
        inv_l = pl.reciprocal(l_sc[...], approx=(compute_dtype != jnp.float32))
        norm = acc_sc[...] * inv_l                                      # (H, TQ, dh)
        # One lane-concat per q tile, then a single out_proj matmul with K = D
        # (replaces the per-head K=dh matmul loop).
        flat = jnp.concatenate([norm[h] for h in range(n_heads)], axis=-1)
        flat = flat.astype(compute_dtype)                               # (TQ, D)
        out = jnp.dot(flat, wo_ref[...], preferred_element_type=jnp.float32)
        o_ref[...] = (out + bo_ref[...]).astype(o_ref.dtype)


# --------------------------------- wrapper ------------------------------------

def _pick_block(n, candidates):
    for c in candidates:
        if n % c == 0:
            return c
    # TODO(synk): non-multiple-of-8/128 sequence lengths fall back to one tile.
    return n


def _pick_block_q(seq_len, batch, candidates=(512, 256, 128, 64, 32, 16, 8)):
    # Prefer the largest q tile that still leaves >= 2 parallel grid units so
    # both v7x TensorCores get work (megacore shards the "parallel" axes).
    divisors = [c for c in candidates if seq_len % c == 0]
    for c in divisors:
        if batch * (seq_len // c) >= 2:
            return c
    return divisors[0] if divisors else seq_len


def _vmem_limit(nbytes):
    # Size the scoped-VMEM limit from the actual buffer sums (+ headroom) rather
    # than a blanket constant; keep well under v7x's 64 MiB physical VMEM.
    return int(min(max(nbytes + (8 << 20), 24 << 20), 100 << 20))


def self_attention(x, w_in, b_in, w_out, b_out, *, n_heads, apply_mask=False,
                   compute_dtype=jnp.bfloat16, block_q=None, block_k=None):
    """x: (B, S, D); w_in: (3D, D); b_in: (3D,); w_out: (D, D); b_out: (D,)."""
    B, S, D = x.shape
    assert D % n_heads == 0
    d_heads = D // n_heads
    scale = 1.0 / math.sqrt(d_heads)
    itemsize = jnp.dtype(compute_dtype).itemsize
    x_itemsize = jnp.dtype(x.dtype).itemsize

    # ---- one-time parameter preprocessing (outside the hot path) ----
    # nn.Linear computes x @ W^T + b; pre-transpose so kernels do plain x @ W.
    w_in_t = jnp.transpose(w_in)                         # (D, 3D), cols = [k | q | v]
    # Fold 1/sqrt(d_heads) into the q chunk (note: rounds slightly differently
    # than scaling the logits, benign).
    col_scale = jnp.concatenate([jnp.ones((D,), jnp.float32),
                                 jnp.full((D,), scale, jnp.float32),
                                 jnp.ones((D,), jnp.float32)])
    w_in_t = (w_in_t * col_scale[None, :]).astype(compute_dtype)
    b_in_2d = (b_in * col_scale).reshape(1, 3 * D).astype(jnp.float32)
    w_out_t = jnp.transpose(w_out).astype(compute_dtype)  # (D, D)
    b_out_2d = b_out.reshape(1, D).astype(jnp.float32)

    # ---- stage 1: in_proj, head-major output (B, 3, H, S, dh) ----
    w_in_bytes = D * 3 * D * itemsize + 3 * D * 4
    block_r = S
    for c in (1024, 512, 256, 128, 64, 32, 16, 8):       # biggest tile that fits
        if S % c == 0:
            tile_bytes = 2 * c * D * x_itemsize + 2 * c * 3 * D * itemsize
            if tile_bytes + w_in_bytes <= (40 << 20):
                block_r = c
                break
    stage1_bytes = (2 * block_r * D * x_itemsize
                    + 2 * block_r * 3 * D * itemsize + w_in_bytes)

    qkv_hm = pl.pallas_call(
        functools.partial(_in_proj_kernel, n_heads=n_heads, d_heads=d_heads,
                          compute_dtype=compute_dtype),
        out_shape=jax.ShapeDtypeStruct((B, 3, n_heads, S, d_heads), compute_dtype),
        grid_spec=pltpu.PrefetchScalarGridSpec(
            num_scalar_prefetch=0,
            grid=(B, S // block_r),
            in_specs=[
                pl.BlockSpec((None, block_r, D), lambda b, i: (b, i, 0)),
                pl.BlockSpec(memory_space=pltpu.MemorySpace.VMEM),   # W_in^T (D, 3D)
                pl.BlockSpec(memory_space=pltpu.MemorySpace.VMEM),   # b_in (1, 3D)
            ],
            out_specs=pl.BlockSpec((None, 3, n_heads, block_r, d_heads),
                                   lambda b, i: (b, 0, 0, i, 0)),
        ),
        compiler_params=pltpu.CompilerParams(
            dimension_semantics=("parallel", "parallel"),
            vmem_limit_bytes=_vmem_limit(stage1_bytes),
        ),
    )(x, w_in_t, b_in_2d)

    # ---- stage 2: flash attention with fused out_proj ----
    bq = block_q if block_q is not None else _pick_block_q(S, B)
    bk = block_k if block_k is not None else _pick_block(S, (256, 128, 64, 32, 16, 8))
    assert S % bq == 0 and S % bk == 0

    if apply_mask:
        def kv_block(i, j):
            # Clamp so fully-masked (skipped) kv tiles re-use the last fetched
            # block -> their K/V DMA is elided along with the compute.
            return jnp.minimum(j, (i * bq + bq - 1) // bk)
    else:
        def kv_block(i, j):
            return j

    kernel = functools.partial(
        _flash_attn_kernel, n_heads=n_heads, block_q=bq, block_k=bk,
        apply_mask=apply_mask, compute_dtype=compute_dtype)

    # TODO(synk): m/l scratches lane-pad (H, bq, 1) -> 128 lanes (~2 MiB each at
    # H=8, bq=512); acceptable within the v7x budget computed below.
    stage2_bytes = (2 * n_heads * bq * d_heads * itemsize          # q (dbl-buffered)
                    + 4 * n_heads * bk * d_heads * itemsize        # k, v
                    + 2 * bq * D * x_itemsize                      # out tile
                    + D * D * itemsize + D * 4                     # W_out^T, b_out
                    + 2 * n_heads * bq * 128 * 4                   # m, l (lane-padded)
                    + n_heads * bq * d_heads * 4)                  # acc

    return pl.pallas_call(
        kernel,
        out_shape=jax.ShapeDtypeStruct((B, S, D), x.dtype),
        grid_spec=pltpu.PrefetchScalarGridSpec(
            num_scalar_prefetch=0,
            grid=(B, S // bq, S // bk),
            in_specs=[
                pl.BlockSpec((None, None, n_heads, bq, d_heads),
                             lambda b, i, j: (b, 1, 0, i, 0)),                 # q
                pl.BlockSpec((None, None, n_heads, bk, d_heads),
                             lambda b, i, j: (b, 0, 0, kv_block(i, j), 0)),    # k
                pl.BlockSpec((None, None, n_heads, bk, d_heads),
                             lambda b, i, j: (b, 2, 0, kv_block(i, j), 0)),    # v
                pl.BlockSpec(memory_space=pltpu.MemorySpace.VMEM),   # W_out^T (D, D)
                pl.BlockSpec(memory_space=pltpu.MemorySpace.VMEM),   # b_out (1, D)
            ],
            out_specs=pl.BlockSpec((None, bq, D), lambda b, i, j: (b, i, 0)),
            scratch_shapes=[
                pltpu.VMEM((n_heads, bq, 1), jnp.float32),           # running max m
                pltpu.VMEM((n_heads, bq, 1), jnp.float32),           # running sum l
                pltpu.VMEM((n_heads, bq, d_heads), jnp.float32),     # running numerator
            ],
        ),
        compiler_params=pltpu.CompilerParams(
            dimension_semantics=("parallel", "parallel", "arbitrary"),
            vmem_limit_bytes=_vmem_limit(stage2_bytes),
        ),
    )(qkv_hm, qkv_hm, qkv_hm, w_out_t, b_out_2d)


# ------------------------------ pure-JAX reference ----------------------------

def _reference(x, w_in, b_in, w_out, b_out, n_heads, apply_mask=False):
    B, S, D = x.shape
    dh = D // n_heads
    qkv = jnp.einsum("bsd,ed->bse", x, w_in) + b_in       # Linear: x @ W^T + b
    k, q, v = jnp.split(qkv, 3, axis=-1)                  # chunk order: k, q, v
    def heads(t):
        return t.reshape(B, S, n_heads, dh).transpose(0, 2, 1, 3)
    q, k, v = heads(q), heads(k), heads(v)
    w = jnp.einsum("bhqd,bhkd->bhqk", q, k) / math.sqrt(dh)
    if apply_mask:
        causal = jnp.tril(jnp.ones((S, S), bool))
        w = jnp.where(causal[None, None], w, -jnp.inf)
    w = jax.nn.softmax(w, axis=-1)
    s = jnp.einsum("bhqk,bhkd->bhqd", w, v)
    s = s.transpose(0, 2, 1, 3).reshape(B, S, D)
    return jnp.einsum("bsd,ed->bse", s, w_out) + b_out


if __name__ == "__main__":
    B, S, D, H = 2, 8, 32, 4

    key = jax.random.PRNGKey(0)
    k1, k2, k3, k4, k5 = jax.random.split(key, 5)
    bound = 1.0 / math.sqrt(D)                            # nn.Linear default init range
    w_in = jax.random.uniform(k1, (3 * D, D), jnp.float32, -bound, bound)
    b_in = jax.random.uniform(k2, (3 * D,), jnp.float32, -bound, bound)
    w_out = jax.random.uniform(k3, (D, D), jnp.float32, -bound, bound)
    b_out = jax.random.uniform(k4, (D,), jnp.float32, -bound, bound)
    x = jax.random.normal(k5, (B, S, D), jnp.float32)

    ref = _reference(x, w_in, b_in, w_out, b_out, H, apply_mask=False)

    # f32 MXU path: tight check vs. the pure-JAX reference.
    out_f32 = self_attention(x, w_in, b_in, w_out, b_out, n_heads=H,
                             apply_mask=False, compute_dtype=jnp.float32)
    out_f32 = jax.block_until_ready(out_f32)
    err = float(jnp.max(jnp.abs(out_f32 - ref)))
    assert err < 2e-3, f"f32 path mismatch, max abs err = {err}"

    # Causal-mask path (f32).
    out_mask = self_attention(x, w_in, b_in, w_out, b_out, n_heads=H,
                              apply_mask=True, compute_dtype=jnp.float32)
    out_mask = jax.block_until_ready(out_mask)
    ref_mask = _reference(x, w_in, b_in, w_out, b_out, H, apply_mask=True)
    err_mask = float(jnp.max(jnp.abs(out_mask - ref_mask)))
    assert err_mask < 2e-3, f"masked path mismatch, max abs err = {err_mask}"

    # bf16 MXU/EUP path (default fast path for v6e/v7x): looser tolerance.
    out_bf16 = self_attention(x, w_in, b_in, w_out, b_out, n_heads=H,
                              apply_mask=False, compute_dtype=jnp.bfloat16)
    out_bf16 = jax.block_until_ready(out_bf16)
    err_bf16 = float(jnp.max(jnp.abs(out_bf16 - ref)))
    assert err_bf16 < 5e-2, f"bf16 path mismatch, max abs err = {err_bf16}"

    print("KERNEL_OK")
</pallas_src>

<mosaic_0001>
module attributes {stable_mosaic.version = 11 : i64} {
  func.func @_in_proj_kernel(%arg0: i32, %arg1: i32, %arg2: memref<1x8x32xf32, #tpu.memory_space<vmem>>, %arg3: memref<32x96xf32, #tpu.memory_space<vmem>>, %arg4: memref<1x96xf32, #tpu.memory_space<vmem>>, %arg5: memref<1x3x4x8x8xf32, #tpu.memory_space<vmem>>) attributes {dimension_semantics = [#tpu.dimension_semantics<parallel>, #tpu.dimension_semantics<parallel>], iteration_bounds = array<i64: 2, 1>, scalar_prefetch = 0 : i64, scratch_operands = 0 : i64, tpu.core_type = #tpu.core_type<tc>, window_params = [{transform_indices = @transform_0, window_bounds = array<i64: 1, 8, 32>}, {pipeline_mode = #tpu.pipeline_mode<synchronous>, transform_indices = @transform_1, window_bounds = array<i64: 32, 96>}, {pipeline_mode = #tpu.pipeline_mode<synchronous>, transform_indices = @transform_2, window_bounds = array<i64: 1, 96>}, {transform_indices = @transform_3, window_bounds = array<i64: 1, 3, 4, 8, 8>}]} {
    %c0 = arith.constant 0 : index
    %c0_0 = arith.constant 0 : index
    %c0_1 = arith.constant 0 : index
    %0 = vector.load %arg2[%c0, %c0_0, %c0_1] : memref<1x8x32xf32, #tpu.memory_space<vmem>>, vector<1x8x32xf32>
    %1 = vector.shape_cast %0 : vector<1x8x32xf32> to vector<8x32xf32>
    %c0_2 = arith.constant 0 : index
    %c0_3 = arith.constant 0 : index
    %2 = vector.load %arg3[%c0_2, %c0_3] : memref<32x96xf32, #tpu.memory_space<vmem>>, vector<32x96xf32>
    %cst = arith.constant dense<0.000000e+00> : vector<8x96xf32>
    %3 = tpu.matmul %1, %2, %cst {dimension_numbers = #tpu.dot_dimension_numbers<[1], [0], [0], [1], [0, 0, 1, 1], [], []>} : vector<8x32xf32>, vector<32x96xf32>, vector<8x96xf32> -> vector<8x96xf32>
    %c0_4 = arith.constant 0 : index
    %c0_5 = arith.constant 0 : index
    %4 = vector.load %arg4[%c0_4, %c0_5] : memref<1x96xf32, #tpu.memory_space<vmem>>, vector<1x96xf32>
    %5 = vector.broadcast %4 : vector<1x96xf32> to vector<8x96xf32>
    %6 = arith.addf %3, %5 : vector<8x96xf32>
    %7 = vector.extract_strided_slice %6 {offsets = [0, 0], sizes = [8, 8], strides = [1, 1]} : vector<8x96xf32> to vector<8x8xf32>
    %c0_6 = arith.constant 0 : index
    %c0_7 = arith.constant 0 : index
    %c0_8 = arith.constant 0 : index
    %c0_9 = arith.constant 0 : index
    %c0_10 = arith.constant 0 : index
    %8 = vector.load %arg5[%c0_6, %c0_7, %c0_8, %c0_9, %c0_10] : memref<1x3x4x8x8xf32, #tpu.memory_space<vmem>>, vector<1x1x1x8x8xf32>
    %9 = vector.shape_cast %8 : vector<1x1x1x8x8xf32> to vector<8x8xf32>
    %10 = vector.shape_cast %7 : vector<8x8xf32> to vector<1x1x1x8x8xf32>
    tpu.vector_store %arg5[%c0_6, %c0_7, %c0_8, %c0_9, %c0_10], %10 {strides = array<i32>} : memref<1x3x4x8x8xf32, #tpu.memory_space<vmem>>, vector<1x1x1x8x8xf32>,
    %11 = vector.extract_strided_slice %6 {offsets = [0, 8], sizes = [8, 8], strides = [1, 1]} : vector<8x96xf32> to vector<8x8xf32>
    %c0_11 = arith.constant 0 : index
    %c0_12 = arith.constant 0 : index
    %c1 = arith.constant 1 : index
    %c0_13 = arith.constant 0 : index
    %c0_14 = arith.constant 0 : index
    %12 = vector.load %arg5[%c0_11, %c0_12, %c1, %c0_13, %c0_14] : memref<1x3x4x8x8xf32, #tpu.memory_space<vmem>>, vector<1x1x1x8x8xf32>
    %13 = vector.shape_cast %12 : vector<1x1x1x8x8xf32> to vector<8x8xf32>
    %14 = vector.shape_cast %11 : vector<8x8xf32> to vector<1x1x1x8x8xf32>
    tpu.vector_store %arg5[%c0_11, %c0_12, %c1, %c0_13, %c0_14], %14 {strides = array<i32>} : memref<1x3x4x8x8xf32, #tpu.memory_space<vmem>>, vector<1x1x1x8x8xf32>,
    %15 = vector.extract_strided_slice %6 {offsets = [0, 16], sizes = [8, 8], strides = [1, 1]} : vector<8x96xf32> to vector<8x8xf32>
    %c0_15 = arith.constant 0 : index
    %c0_16 = arith.constant 0 : index
    %c2 = arith.constant 2 : index
    %c0_17 = arith.constant 0 : index
    %c0_18 = arith.constant 0 : index
    %16 = vector.load %arg5[%c0_15, %c0_16, %c2, %c0_17, %c0_18] : memref<1x3x4x8x8xf32, #tpu.memory_space<vmem>>, vector<1x1x1x8x8xf32>
    %17 = vector.shape_cast %16 : vector<1x1x1x8x8xf32> to vector<8x8xf32>
    %18 = vector.shape_cast %15 : vector<8x8xf32> to vector<1x1x1x8x8xf32>
    tpu.vector_store %arg5[%c0_15, %c0_16, %c2, %c0_17, %c0_18], %18 {strides = array<i32>} : memref<1x3x4x8x8xf32, #tpu.memory_space<vmem>>, vector<1x1x1x8x8xf32>,
    %19 = vector.extract_strided_slice %6 {offsets = [0, 24], sizes = [8, 8], strides = [1, 1]} : vector<8x96xf32> to vector<8x8xf32>
    %c0_19 = arith.constant 0 : index
    %c0_20 = arith.constant 0 : index
    %c3 = arith.constant 3 : index
    %c0_21 = arith.constant 0 : index
    %c0_22 = arith.constant 0 : index
    %20 = vector.load %arg5[%c0_19, %c0_20, %c3, %c0_21, %c0_22] : memref<1x3x4x8x8xf32, #tpu.memory_space<vmem>>, vector<1x1x1x8x8xf32>
    %21 = vector.shape_cast %20 : vector<1x1x1x8x8xf32> to vector<8x8xf32>
    %22 = vector.shape_cast %19 : vector<8x8xf32> to vector<1x1x1x8x8xf32>
    tpu.vector_store %arg5[%c0_19, %c0_20, %c3, %c0_21, %c0_22], %22 {strides = array<i32>} : memref<1x3x4x8x8xf32, #tpu.memory_space<vmem>>, vector<1x1x1x8x8xf32>,
    %23 = vector.extract_strided_slice %6 {offsets = [0, 32], sizes = [8, 8], strides = [1, 1]} : vector<8x96xf32> to vector<8x8xf32>
    %c0_23 = arith.constant 0 : index
    %c1_24 = arith.constant 1 : index
    %c0_25 = arith.constant 0 : index
    %c0_26 = arith.constant 0 : index
    %c0_27 = arith.constant 0 : index
    %24 = vector.load %arg5[%c0_23, %c1_24, %c0_25, %c0_26, %c0_27] : memref<1x3x4x8x8xf32, #tpu.memory_space<vmem>>, vector<1x1x1x8x8xf32>
    %25 = vector.shape_cast %24 : vector<1x1x1x8x8xf32> to vector<8x8xf32>
    %26 = vector.shape_cast %23 : vector<8x8xf32> to vector<1x1x1x8x8xf32>
    tpu.vector_store %arg5[%c0_23, %c1_24, %c0_25, %c0_26, %c0_27], %26 {strides = array<i32>} : memref<1x3x4x8x8xf32, #tpu.memory_space<vmem>>, vector<1x1x1x8x8xf32>,
    %27 = vector.extract_strided_slice %6 {offsets = [0, 40], sizes = [8, 8], strides = [1, 1]} : vector<8x96xf32> to vector<8x8xf32>
    %c0_28 = arith.constant 0 : index
    %c1_29 = arith.constant 1 : index
    %c1_30 = arith.constant 1 : index
    %c0_31 = arith.constant 0 : index
    %c0_32 = arith.constant 0 : index
    %28 = vector.load %arg5[%c0_28, %c1_29, %c1_30, %c0_31, %c0_32] : memref<1x3x4x8x8xf32, #tpu.memory_space<vmem>>, vector<1x1x1x8x8xf32>
    %29 = vector.shape_cast %28 : vector<1x1x1x8x8xf32> to vector<8x8xf32>
    %30 = vector.shape_cast %27 : vector<8x8xf32> to vector<1x1x1x8x8xf32>
    tpu.vector_store %arg5[%c0_28, %c1_29, %c1_30, %c0_31, %c0_32], %30 {strides = array<i32>} : memref<1x3x4x8x8xf32, #tpu.memory_space<vmem>>, vector<1x1x1x8x8xf32>,
    %31 = vector.extract_strided_slice %6 {offsets = [0, 48], sizes = [8, 8], strides = [1, 1]} : vector<8x96xf32> to vector<8x8xf32>
    %c0_33 = arith.constant 0 : index
    %c1_34 = arith.constant 1 : index
    %c2_35 = arith.constant 2 : index
    %c0_36 = arith.constant 0 : index
    %c0_37 = arith.constant 0 : index
    %32 = vector.load %arg5[%c0_33, %c1_34, %c2_35, %c0_36, %c0_37] : memref<1x3x4x8x8xf32, #tpu.memory_space<vmem>>, vector<1x1x1x8x8xf32>
    %33 = vector.shape_cast %32 : vector<1x1x1x8x8xf32> to vector<8x8xf32>
    %34 = vector.shape_cast %31 : vector<8x8xf32> to vector<1x1x1x8x8xf32>
    tpu.vector_store %arg5[%c0_33, %c1_34, %c2_35, %c0_36, %c0_37], %34 {strides = array<i32>} : memref<1x3x4x8x8xf32, #tpu.memory_space<vmem>>, vector<1x1x1x8x8xf32>,
    %35 = vector.extract_strided_slice %6 {offsets = [0, 56], sizes = [8, 8], strides = [1, 1]} : vector<8x96xf32> to vector<8x8xf32>
    %c0_38 = arith.constant 0 : index
    %c1_39 = arith.constant 1 : index
    %c3_40 = arith.constant 3 : index
    %c0_41 = arith.constant 0 : index
    %c0_42 = arith.constant 0 : index
    %36 = vector.load %arg5[%c0_38, %c1_39, %c3_40, %c0_41, %c0_42] : memref<1x3x4x8x8xf32, #tpu.memory_space<vmem>>, vector<1x1x1x8x8xf32>
    %37 = vector.shape_cast %36 : vector<1x1x1x8x8xf32> to vector<8x8xf32>
    %38 = vector.shape_cast %35 : vector<8x8xf32> to vector<1x1x1x8x8xf32>
    tpu.vector_store %arg5[%c0_38, %c1_39, %c3_40, %c0_41, %c0_42], %38 {strides = array<i32>} : memref<1x3x4x8x8xf32, #tpu.memory_space<vmem>>, vector<1x1x1x8x8xf32>,
    %39 = vector.extract_strided_slice %6 {offsets = [0, 64], sizes = [8, 8], strides = [1, 1]} : vector<8x96xf32> to vector<8x8xf32>
    %c0_43 = arith.constant 0 : index
    %c2_44 = arith.constant 2 : index
    %c0_45 = arith.constant 0 : index
    %c0_46 = arith.constant 0 : index
    %c0_47 = arith.constant 0 : index
    %40 = vector.load %arg5[%c0_43, %c2_44, %c0_45, %c0_46, %c0_47] : memref<1x3x4x8x8xf32, #tpu.memory_space<vmem>>, vector<1x1x1x8x8xf32>
    %41 = vector.shape_cast %40 : vector<1x1x1x8x8xf32> to vector<8x8xf32>
    %42 = vector.shape_cast %39 : vector<8x8xf32> to vector<1x1x1x8x8xf32>
    tpu.vector_store %arg5[%c0_43, %c2_44, %c0_45, %c0_46, %c0_47], %42 {strides = array<i32>} : memref<1x3x4x8x8xf32, #tpu.memory_space<vmem>>, vector<1x1x1x8x8xf32>,
    %43 = vector.extract_strided_slice %6 {offsets = [0, 72], sizes = [8, 8], strides = [1, 1]} : vector<8x96xf32> to vector<8x8xf32>
    %c0_48 = arith.constant 0 : index
    %c2_49 = arith.constant 2 : index
    %c1_50 = arith.constant 1 : index
    %c0_51 = arith.constant 0 : index
    %c0_52 = arith.constant 0 : index
    %44 = vector.load %arg5[%c0_48, %c2_49, %c1_50, %c0_51, %c0_52] : memref<1x3x4x8x8xf32, #tpu.memory_space<vmem>>, vector<1x1x1x8x8xf32>
    %45 = vector.shape_cast %44 : vector<1x1x1x8x8xf32> to vector<8x8xf32>
    %46 = vector.shape_cast %43 : vector<8x8xf32> to vector<1x1x1x8x8xf32>
    tpu.vector_store %arg5[%c0_48, %c2_49, %c1_50, %c0_51, %c0_52], %46 {strides = array<i32>} : memref<1x3x4x8x8xf32, #tpu.memory_space<vmem>>, vector<1x1x1x8x8xf32>,
    %47 = vector.extract_strided_slice %6 {offsets = [0, 80], sizes = [8, 8], strides = [1, 1]} : vector<8x96xf32> to vector<8x8xf32>
    %c0_53 = arith.constant 0 : index
    %c2_54 = arith.constant 2 : index
    %c2_55 = arith.constant 2 : index
    %c0_56 = arith.constant 0 : index
    %c0_57 = arith.constant 0 : index
    %48 = vector.load %arg5[%c0_53, %c2_54, %c2_55, %c0_56, %c0_57] : memref<1x3x4x8x8xf32, #tpu.memory_space<vmem>>, vector<1x1x1x8x8xf32>
    %49 = vector.shape_cast %48 : vector<1x1x1x8x8xf32> to vector<8x8xf32>
    %50 = vector.shape_cast %47 : vector<8x8xf32> to vector<1x1x1x8x8xf32>
    tpu.vector_store %arg5[%c0_53, %c2_54, %c2_55, %c0_56, %c0_57], %50 {strides = array<i32>} : memref<1x3x4x8x8xf32, #tpu.memory_space<vmem>>, vector<1x1x1x8x8xf32>,
    %51 = vector.extract_strided_slice %6 {offsets = [0, 88], sizes = [8, 8], strides = [1, 1]} : vector<8x96xf32> to vector<8x8xf32>
    %c0_58 = arith.constant 0 : index
    %c2_59 = arith.constant 2 : index
    %c3_60 = arith.constant 3 : index
    %c0_61 = arith.constant 0 : index
    %c0_62 = arith.constant 0 : index
    %52 = vector.load %arg5[%c0_58, %c2_59, %c3_60, %c0_61, %c0_62] : memref<1x3x4x8x8xf32, #tpu.memory_space<vmem>>, vector<1x1x1x8x8xf32>
    %53 = vector.shape_cast %52 : vector<1x1x1x8x8xf32> to vector<8x8xf32>
    %54 = vector.shape_cast %51 : vector<8x8xf32> to vector<1x1x1x8x8xf32>
    tpu.vector_store %arg5[%c0_58, %c2_59, %c3_60, %c0_61, %c0_62], %54 {strides = array<i32>} : memref<1x3x4x8x8xf32, #tpu.memory_space<vmem>>, vector<1x1x1x8x8xf32>,
    return
  }
  func.func @transform_0(%arg0: i32, %arg1: i32) -> (i32, i32, i32) {
    %c0_i32 = arith.constant 0 : i32
    %c0_i32_0 = arith.constant 0 : i32
    return %arg0, %arg1, %c0_i32 : i32, i32, i32
  }
  func.func @transform_1(%arg0: i32, %arg1: i32) -> (i32, i32) {
    %c0_i32 = arith.constant 0 : i32
    %c0_i32_0 = arith.constant 0 : i32
    %c0_i32_1 = arith.constant 0 : i32
    return %c0_i32, %c0_i32_0 : i32, i32
  }
  func.func @transform_2(%arg0: i32, %arg1: i32) -> (i32, i32) {
    %c0_i32 = arith.constant 0 : i32
    %c0_i32_0 = arith.constant 0 : i32
    %c0_i32_1 = arith.constant 0 : i32
    return %c0_i32, %c0_i32_0 : i32, i32
  }
  func.func @transform_3(%arg0: i32, %arg1: i32) -> (i32, i32, i32, i32, i32) {
    %c0_i32 = arith.constant 0 : i32
    %c0_i32_0 = arith.constant 0 : i32
    %c0_i32_1 = arith.constant 0 : i32
    %c0_i32_2 = arith.constant 0 : i32
    return %arg0, %c0_i32, %c0_i32_0, %arg1, %c0_i32_1 : i32, i32, i32, i32, i32
  }
}

</mosaic_0001>

<bundles_post_ra>
// kernel: tpu_custom_call.1
= control target key start
LH: loop header
LB: loop body
LE: loop exit
PB: predicated region body
PF: predicated region fallthrough
CT: control target
= control target key end

     0   :  { %8 = vsyncpa [#allocation3], 0  ;;  %s898_s0 = inlined_call_operand.hbm [shape: f32[2,8,32], index: 0, kind: input, shape index: {}]   ;;  %s899_s1 = inlined_call_operand.hbm [shape: f32[32,96], index: 1, kind: input, shape index: {}]   ;;  %s900_s2 = inlined_call_operand.vmem [shape: f32[1,96], index: 2, kind: input, shape index: {}]   ;;  %s901_s3 = inlined_call_operand.hbm [shape: f32[2,3,4,8,8], index: 3, kind: output, shape index: {}]  }
   0x1   :  { %10 = vsyncpa [#allocation3 + $0x1], 0 }
   0x2   :  { %11 = vsyncpa [#allocation6], 0 }
   0x3   :  { %12 = vsyncpa [#allocation4], 0 }
   0x4   :  { %14 = vsyncpa [#allocation4 + $0x1], 0  ;;  %s724_s12 = smov 0   ;;  %s726_s13 = smov 0  }
   0x5   :  { %s728_s14 = smov 0   ;;  %s730_s15 = smov 0  }
   0x6   :  { %s732_s16 = smov 0   ;;  %s734_s17 = smov 0  }
   0x7 LB: > { %s424_s18 = sadd.s32 4294967295, %s686_s17   ;;  %p426_p0 = scmp.ge.s32.totalorder %s686_s17, 1  ;;  %s686_s17 = sphi %s734_s17, %s20_s17   ;;  %s682_s16 = sphi %s732_s16, %s912_s16   ;;  %s678_s15 = sphi %s730_s15, %s911_s15   ;;  %s674_s14 = sphi %s728_s14, %s910_s14   ;;  %s670_s13 = sphi %s726_s13, %s909_s13   ;;  %s666_s12 = sphi %s724_s12, %s908_s12  }
   0x8   : > { %p756_p1 = scmp.eq.s32.totalorder %s424_s18, 0  ;;  %p135_p2 = scmp.lt.s32.totalorder %s686_s17, 3 }
   0x9   : > { %s146_s22 = sshll.u32 %s899_s1, 4  ;;  %s688_s24 = smov [#allocation5]   ;;  %s147_s22 = int_to_ptr.hbm [resolvable:$true] %s146_s22 }
   0xa   : > { %p764_p3 = pnand %p426_p0, %p135_p2  ;;  %s148_s25 = sshll.u32 %s688_s24, 4  ;;  %s149_s25 = int_to_ptr.vmem [resolvable:$true] %s148_s25 }
   0xb   : > { %p428_p6 = scmp.ge.s32.totalorder %s686_s17, 2  ;;  %s689_s26 = smov 128  }
   0xc   : > { %p459_p4 = pneg %p764_p3  ;;  %s690_s27 = smov 8  }
   0xd   : > { %s425_s28 = sadd.s32 4294967294, %s686_s17   ;;  %s32_s29 = sadd.s32 1, %s682_s16 }
   0xe   : > { %p460_p5 = pnand %p459_p4, %p756_p1  ;;  %s41_s30 = sadd.s32 1, %s674_s14 }
   0xf   : > { %p34_p7 = scmp.ge.s32.totalorder %s32_s29, 2  ;;  %p48_p8 = scmp.ne.s32.totalorder %s674_s14, %s670_s13 }
  0x10   : > { %462 = dma.hbm_to_vmem [thread:$0]  (!%p460_p5), %s147_s22, 512, %s149_s25, [#allocation6], %s689_s26, %s689_s26, %s690_s27  }
  0x11   : > { %p49_p9 = scmp.eq.s32.totalorder %s686_s17, 0  ;;  %p54_p10 = scmp.ne.s32.totalorder %s670_s13, %s666_s12 }
  0x12   : > { %s914_s29 = smov (%p34_p7, %s32_s29), 0  ;;  %p122_p13 = scmp.eq.s32.totalorder %s424_s18, 1 }
  0x13   : > { %p783_p11 = por %p49_p9, %p48_p8  ;;  %p789_p12 = por %p756_p1, %p54_p10 }
  0x14   : > { %s36_s6 = ssub.s32 %s682_s16, %s914_s29  ;;  %p128_p2 = scmp.eq.s32.totalorder %s425_s28, 1 }
  0x15   : > { %p39_p0 = scmp.eq.s32.totalorder %s36_s6, 0  ;;  %p795_p4 = por %p122_p13, %p48_p8 }
  0x16   : > { %p472_p5 = scmp.lt.s32.totalorder %s686_s17, 2  ;;  %p803_p7 = por %p128_p2, %p54_p10 }
  0x17   : > { %s801_s8 = scalar_select %p39_p0, %s674_s14, %s41_s30  }
  0x18   : > { %s165_s10 = sand.u32 1, %s674_s14   ;;  %s430_s20 = sshll.u32 %s682_s16, 3 }
  0x19   : > { %s429_s11 = sshll.u32 %s165_s10, 3  ;;  %s174_s18 = scalar_lea.hbm %s898_s0, %s430_s20 }
  0x1a   : > { %s169_s24 = scalar_lea.vmem [#allocation2], %s429_s11  ;;  %s176_s26 = sshll.u32 %s174_s18, 4  ;;  %s177_s26 = int_to_ptr.hbm [resolvable:$true] %s176_s26 }
  0x1b   : > { %s178_s25 = sshll.u32 %s169_s24, 4  ;;  %p464_p8 = pnand %p472_p5, %p783_p11  ;;  %s179_s25 = int_to_ptr.vmem [resolvable:$true] %s178_s25 }
  0x1c   : > { %s166_s27 = scalar_lea.sflag [#allocation3], %s165_s10  ;;  %187 = sbr.rel (%p764_p3) target bundleno = 316 (0x13c), region = 32 }
  0x1d   : > { %466 = dma.hbm_to_vmem [thread:$0]  (!%p464_p8), %s177_s26, 128, %s179_s25, %s166_s27  }
  0x1e   : > { %s817_s28 = sand.u32 (!%p764_p3), 1, %s670_s13  }
  0x1f   : > { %s432_s30 = sshll.u32 (!%p764_p3), %s817_s28, 3  ;;  %s190_s6 = scalar_lea.sflag (!%p764_p3), [#allocation3], %s817_s28 }
  0x20   : > { %s193_s11 = scalar_lea.vmem (!%p764_p3), [#allocation2], %s432_s30 }
  0x21   : > { %653 = dma.done.wait (%p789_p12), %s190_s6, 128  }
  0x22   : > { %655 = vsyncadd (%p789_p12), %s190_s6, 4294967168 }
  0x23   : > { %657 = dma.done.wait (%p756_p1), [#allocation6], 512  }
  0x24   : > { %659 = vsyncadd (%p756_p1), [#allocation6], 4294966784  ;;  %v226_v0 = vld [vmem:[#allocation5 + $0x18] sm:$0xff]  ;;  %v225_v1 = vld [vmem:[#allocation5 + $0x10] sm:$0xff]  ;;  %vm231_vm0 = vcmask 261120   ;;  %s449_s23 = smul.u32 96, %s817_s28 }
  0x25   : > { %247 = vmatpush.msra.mxu0 %v226_v0  ;;  %v224_v2 = vld [vmem:[#allocation5 + $0x8] sm:$0xff]  ;;  %v223_v3 = vld [vmem:[#allocation5] sm:$0xff]  ;;  %v222_v4 = vld [vmem:[%s193_s11] sm:$0xff]  ;;  %vm255_vm1 = vcmask 64512   ;;  %s691_s19 = smov 88   ;;  %s692_s10 = smov 104  }
  0x26   : > { %v539_v5 = vld [vmem:[%s900_s2] ss:$0 sm:$0xff]  ;;  %s833_s20 = scalar_lea.vmem [#allocation7], %s449_s23  ;;  %s693_s21 = smov 120  }
  0x27   : > { %248 = vmatpush.msra.mxu0 %v225_v1  ;;  %s694_s22 = smov 80   ;;  %s695_s18 = smov 96  }
  0x28   : > { %s696_s24 = smov 112   ;;  %s697_s25 = smov 56  }
  0x29   : > { %249 = vmatpush.msra.mxu0 %v224_v2  ;;  %s698_s26 = smov 64   ;;  %s699_s27 = smov 72  }
  0x2a   : > { %s700_s30 = smov 40   ;;  %s701_s6 = smov 48  }
  0x2b   : > { %250 = vmatpush.msra.mxu0 %v223_v3  ;;  %s450_s11 = smul.u32 96, %s678_s15  ;;  %s314_s15 = scalar_lea.sflag [#allocation4], %s817_s28 }
  0x2c   : > { %434 = vmatmul.msk.f32.vlgmr.msra.gmra.mxu0 %vm231_vm0, %v222_v4 }
  0x2d   : > { %s326_s5 = scalar_lea.hbm %s901_s3, %s450_s11 }
  0xa9   : > { %v252_v6 = vpop.f32.mrf.mxu0 }
  0xaa   : > { %v253_v7 = vadd.f32 %v539_v5, %v252_v6 }
  0xac   : > { %278 = vrot.lane.b32.xlu2 %v253_v7, %s691_s19  ;;  %268 = vrot.lane.b32.xlu1 %v253_v7, %s692_s10  ;;  %256 = vst.msk [vmem:[%s833_s20] sm:$0xff] %vm255_vm1, %v253_v7  ;;  %s327_s19 = sshll.u32 %s833_s20, 4  ;;  %s329_s10 = sshll.u32 %s326_s5, 4  ;;  %s328_s19 = int_to_ptr.vmem [resolvable:$true] %s327_s19  ;;  %s330_s10 = int_to_ptr.hbm [resolvable:$true] %s329_s10 }
  0xad   : > { %258 = vrot.lane.b32.xlu0 %v253_v7, %s693_s21  ;;  %s614_s21 = sshra.s32 %s330_s10, 4  ;;  %s615_s21 = int_to_ptr.hbm [resolvable:$true] %s614_s21 }
  0xae   : > { %p621_p10 = scmp.lt.s32.totalorder %s615_s21, %s901_s3 }
  0xb4   : > { %283 = vrot.lane.b32.xlu2 %v253_v7, %s694_s22  ;;  %273 = vrot.lane.b32.xlu1 %v253_v7, %s695_s18  ;;  %s616_s22 = scalar_lea.hbm %s615_s21, 96 }
  0xb5   : > { %263 = vrot.lane.b32.xlu0 %v253_v7, %s696_s24  ;;  %p617_p1 = scmp.ne.s32.totalorder %s615_s21, %s616_s22 }
  0xb7   : > { %p618_p3 = pnand %p617_p1, %p795_p4 }
  0xb9   : > { %p619_p9 = pneg %p618_p3 }
  0xbc   : > { %298 = vrot.lane.b32.xlu2 %v253_v7, %s697_s25  ;;  %293 = vrot.lane.b32.xlu1 %v253_v7, %s698_s26  ;;  %s620_s25 = scalar_lea.hbm %s901_s3, 192 }
  0xbd   : > { %288 = vrot.lane.b32.xlu0 %v253_v7, %s699_s27  ;;  %p622_p11 = scmp.lt.s32.totalorder %s620_s25, %s616_s22 }
  0xbf   : > { %p623_p12 = por %p622_p11, %p621_p10 }
  0xc1   : > { %p624_p13 = pnand %p623_p12, %p619_p9 }
  0xc4   : > { %308 = vrot.lane.b32.xlu1 %v253_v7, %s700_s30 }
  0xc5   : > { %303 = vrot.lane.b32.xlu0 %v253_v7, %s701_s6 }
 0x106   : > { %v279_v8 = vpop.permute.xlu2 %278 }
 0x107   : > { %439 = vst.msk [vmem:[%s833_s20 + $0x28] sm:$0xff] %vm255_vm1, %v279_v8 }
 0x10e   : > { %v284_v9 = vpop.permute.xlu2 %283 }
 0x10f   : > { %440 = vst.msk [vmem:[%s833_s20 + $0x30] sm:$0xff] %vm255_vm1, %v284_v9 }
 0x116   : > { %v299_v10 = vpop.permute.xlu2 %298 }
 0x117   : > { %443 = vst.msk [vmem:[%s833_s20 + $0x48] sm:$0xff] %vm255_vm1, %v299_v10 }
 0x11e   : > { %v269_v11 = vpop.permute.xlu1 %268 }
 0x11f   : > { %437 = vst.msk [vmem:[%s833_s20 + $0x18] sm:$0xff] %vm255_vm1, %v269_v11  ;;  %v259_v12 = vpop.permute.xlu0 %258 }
 0x120   : > { %435 = vst.msk [vmem:[%s833_s20 + $0x8] sm:$0xff] %vm255_vm1, %v259_v12 }
 0x126   : > { %v274_v13 = vpop.permute.xlu1 %273 }
 0x127   : > { %438 = vst.msk [vmem:[%s833_s20 + $0x20] sm:$0xff] %vm255_vm1, %v274_v13  ;;  %v264_v14 = vpop.permute.xlu0 %263 }
 0x128   : > { %436 = vst.msk [vmem:[%s833_s20 + $0x10] sm:$0xff] %vm255_vm1, %v264_v14 }
 0x12e   : > { %v294_v15 = vpop.permute.xlu1 %293 }
 0x12f   : > { %442 = vst.msk [vmem:[%s833_s20 + $0x40] sm:$0xff] %vm255_vm1, %v294_v15  ;;  %v289_v16 = vpop.permute.xlu0 %288 }
 0x130   : > { %441 = vst.msk [vmem:[%s833_s20 + $0x38] sm:$0xff] %vm255_vm1, %v289_v16 }
 0x136   : > { %v309_v17 = vpop.permute.xlu1 %308 }
 0x137   : > { %445 = vst.msk [vmem:[%s833_s20 + $0x58] sm:$0xff] %vm255_vm1, %v309_v17  ;;  %v304_v18 = vpop.permute.xlu0 %303 }
 0x138   : > { %444 = vst.msk [vmem:[%s833_s20 + $0x50] sm:$0xff] %vm255_vm1, %v304_v18 }
 0x139   : > { %627 = shalt.err (!%p624_p13)
}
 0x13a   : > { %s702_s28 = smov 128   ;;  %s703_s20 = smov 8  }
 0x13b   : > { %457 = dma.vmem_to_hbm [thread:$0]  (%p795_p4), %s328_s19, 1536, %s330_s10, %s314_s15, %s702_s28, %s702_s28, %s703_s20  }
 0x13c PF: > { %s344_s30 = sand.u32 1, %s666_s12   ;;  %p468_p0 = pnand %p428_p6, %p803_p7 }
 0x13d   : > { %s345_s6 = scalar_lea.sflag [#allocation4], %s344_s30 }
 0x13e   : > { %p469_p2 = pneg %p468_p0 }
 0x140   : > { %661 = dma.done.wait (%p469_p2), %s345_s6, 1536  }
 0x141   : > { %663 = vsyncadd (%p469_p2), %s345_s6, 4294965760  ;;  %s20_s17 = sadd.s32 1, %s686_s17   ;;  %s908_s12 = smov %s670_s13 }
 0x142   : > { %p17_p5 = scmp.ge.s32.totalorder %s20_s17, 4   ;;  %s909_s13 = smov %s674_s14 }
 0x143   : > { %s910_s14 = smov %s801_s8  ;;  %s911_s15 = smov %s682_s16 }
 0x144   : > { %s912_s16 = smov %s914_s29  ;;  %19 = sbr.rel (!%p17_p5) target bundleno = 7 (0x7), region = 92 }
 0x149   :  { %351 = vsyncpa [#allocation3], 1 }
 0x14a   :  { %353 = vsyncpa [#allocation3 + $0x1], 1 }
 0x14b   :  { %354 = vsyncpa [#allocation6], 1 }
 0x14c   :  { %355 = vsyncpa [#allocation4], 1 }
 0x14d   :  { %357 = vsyncpa [#allocation4 + $0x1], 1 }

</bundles_post_ra>
